<compile_context>
chip_gen: v5e
topology: v5e:2x2
jax: 0.10.0
libtpu: 0.0.40
codegen_flags: <defaults>
</compile_context>

<pallas_src>
import math
import functools

import jax
import jax.numpy as jnp
from jax.experimental import pallas as pl
from jax.experimental.pallas import tpu as pltpu


def _make_kernel(seq_len, block_seq, batch_pad, hidden, n_feat):
    """Builds the chunked LSTM kernel with static sizes closed over."""
    S, Ts, B, H, F = seq_len, block_seq, batch_pad, hidden, n_feat
    mask_tail = (S % Ts) != 0  # padded time steps exist only in the last chunk

    def kernel(x_ref, wih_ref, whh_ref, b_ref, wq_ref, bq_ref,
               out_ref, xw_scr, h_scr, c_scr):
        s = pl.program_id(0)
        n_chunks = pl.num_programs(0)

        # ---- init carried state on the first chunk --------------------------
        @pl.when(s == 0)
        def _():
            h_scr[...] = jnp.zeros_like(h_scr)
            c_scr[...] = jnp.zeros_like(c_scr)

        # ---- Phase 1: per-chunk, time-parallel input projection -------------
        bias = b_ref[...].astype(jnp.float32)                       # (1, 4H)
        if F >= 128:
            # Real contraction depth -> MXU.
            xw_scr[...] = (jnp.dot(x_ref[...], wih_ref[...],
                                   preferred_element_type=jnp.float32) + bias)
        else:
            # Degenerate K: VPU broadcast outer-product, no MXU fill/drain.
            x = x_ref[...].astype(jnp.float32)                      # (Ts*B, F)
            proj = bias                                             # (1, 4H)
            for f in range(F):                                      # static, tiny
                proj = proj + x[:, f:f + 1] * wih_ref[f:f + 1, :].astype(jnp.float32)
            xw_scr[...] = proj

        # ---- loop-invariant hoists ------------------------------------------
        whh = whh_ref[...]                                          # (H, 4H)
        # Column scale so one tanh over (B,4H) yields all four gates:
        #   sigmoid(z) = 0.5 * tanh(0.5*z) + 0.5 ; g-gate keeps scale 1.
        col = jax.lax.broadcasted_iota(jnp.int32, (1, 4 * H), 1)
        gscale = jnp.where((col >= 2 * H) & (col < 3 * H), 1.0, 0.5)
        gscale = jnp.broadcast_to(gscale.astype(jnp.float32), (B, 4 * H))

        chunk_start = s * Ts

        # ---- Phase 2: serial recurrence over this chunk ----------------------
        def step(t, carry):
            h, c = carry
            row = pl.multiple_of(t * B, B)                 # sublane-aligned
            gates = (xw_scr[pl.ds(row, B), :]              # (B, 4H) precomputed
                     + jnp.dot(h.astype(whh.dtype), whh,
                               preferred_element_type=jnp.float32))
            tg = jnp.tanh(gates * gscale)                  # single EUP pass
            i_g = 0.5 * tg[:, 0 * H:1 * H] + 0.5
            f_g = 0.5 * tg[:, 1 * H:2 * H] + 0.5
            g_g = tg[:, 2 * H:3 * H]
            o_g = 0.5 * tg[:, 3 * H:4 * H] + 0.5
            c_new = f_g * c + i_g * g_g
            h_new = o_g * jnp.tanh(c_new)
            if mask_tail:
                valid = (chunk_start + t) < S
                h_new = jnp.where(valid, h_new, h)
                c_new = jnp.where(valid, c_new, c)
            return h_new, c_new

        h0 = h_scr[...]
        c0 = c_scr[...]
        h_f, c_f = jax.lax.fori_loop(0, Ts, step, (h0, c0),
                                     unroll=min(Ts, 8))
        h_scr[...] = h_f
        c_scr[...] = c_f

        # ---- Phase 3: quantile heads, one lane-dense (B,128) matmul ----------
        @pl.when(s == n_chunks - 1)
        def _():
            out_ref[...] = (jnp.dot(h_f.astype(wq_ref.dtype), wq_ref[...],
                                    preferred_element_type=jnp.float32)
                            + bq_ref[...].astype(jnp.float32))

    return kernel


def _vmem_limit_bytes(Ts, B_pad, F, H, Q_pad, in_itemsize):
    """Explicit scoped-VMEM request with headroom, capped for v7x (64 MiB)."""
    x_chunk = 2 * Ts * B_pad * F * in_itemsize                  # double-buffered
    weights = 2 * (F * 4 * H + H * 4 * H + 4 * H + H * Q_pad + Q_pad) * in_itemsize
    out = 2 * B_pad * Q_pad * 4
    scratch = (Ts * B_pad * 4 * H + 2 * B_pad * H) * 4
    need = x_chunk + weights + out + scratch
    return int(min(max(2 * need + (4 << 20), 16 << 20), 48 << 20))


def lstm_model_forward(x, params, compute_dtype=jnp.float32, seq_chunk=None):
    """x: (batch, seq, features) float32.  Returns a tuple of per-quantile
    outputs, each (batch, 1).  compute_dtype=bf16 enables the v6e/v7x MXU fast
    path (f32 accumulation and f32 h/c state are kept either way)."""
    wih, whh, b, wq, bq = params          # (F,4H), (H,4H), (1,4H), (H,Q), (1,Q)
    B, S, F = x.shape
    H = whh.shape[0]
    Q = wq.shape[1]

    # Sublane-friendly batch padding: 8 rows (f32) / 16 rows (packed bf16).
    sub = 16 if compute_dtype == jnp.bfloat16 else 8
    B_pad = max(sub, ((B + sub - 1) // sub) * sub)
    Q_pad = 128                            # lane-dense head

    # Sequence chunking (bounds VMEM to O(Ts) and pipelines the x DMA).
    if seq_chunk is None:
        seq_chunk = 32
    Ts = max(1, min(seq_chunk, S))
    n_chunks = -(-S // Ts)
    S_pad = n_chunks * Ts

    x_tm = jnp.transpose(x, (1, 0, 2))                               # (S, B, F)
    x_tm = jnp.pad(x_tm, ((0, S_pad - S), (0, B_pad - B), (0, 0)))
    x_flat = x_tm.reshape(S_pad * B_pad, F).astype(compute_dtype)

    wq_p = jnp.pad(wq, ((0, 0), (0, Q_pad - Q)))
    bq_p = jnp.pad(bq, ((0, 0), (0, Q_pad - Q)))

    wih_c = wih.astype(compute_dtype)
    whh_c = whh.astype(compute_dtype)
    wq_c = wq_p.astype(compute_dtype)

    kernel = _make_kernel(S, Ts, B_pad, H, F)

    grid_spec = pltpu.PrefetchScalarGridSpec(
        num_scalar_prefetch=0,
        grid=(n_chunks,),
        in_specs=[
            # x: one (Ts*B_pad, F) chunk per grid step.
            pl.BlockSpec((Ts * B_pad, F), lambda s: (s, 0)),
            # Constant weights: same block every step -> no re-DMA.
            pl.BlockSpec((F, 4 * H), lambda s: (0, 0)),
            pl.BlockSpec((H, 4 * H), lambda s: (0, 0)),
            pl.BlockSpec((1, 4 * H), lambda s: (0, 0)),
            pl.BlockSpec((H, Q_pad), lambda s: (0, 0)),
            pl.BlockSpec((1, Q_pad), lambda s: (0, 0)),
        ],
        out_specs=pl.BlockSpec((B_pad, Q_pad), lambda s: (0, 0)),
        scratch_shapes=[
            pltpu.VMEM((Ts * B_pad, 4 * H), jnp.float32),   # x.W_ih + b chunk
            pltpu.VMEM((B_pad, H), jnp.float32),            # h carry
            pltpu.VMEM((B_pad, H), jnp.float32),            # c carry
        ],
    )

    out = pl.pallas_call(
        kernel,
        out_shape=jax.ShapeDtypeStruct((B_pad, Q_pad), jnp.float32),
        grid_spec=grid_spec,
        compiler_params=pltpu.CompilerParams(
            dimension_semantics=("arbitrary",),
            vmem_limit_bytes=_vmem_limit_bytes(
                Ts, B_pad, F, H, Q_pad, jnp.dtype(compute_dtype).itemsize),
        ),
    )(x_flat, wih_c, whh_c, b, wq_c, bq_p)

    out = out[:B, :Q]
    return tuple(out[:, q:q + 1] for q in range(Q))


def lstm_model_reference(x, params):
    """Pure-JAX reference (lax.scan LSTM) for correctness checking."""
    wih, whh, b, wq, bq = params
    B, S, F = x.shape
    H = whh.shape[0]
    x_tm = jnp.transpose(x, (1, 0, 2))

    def step(carry, x_t):
        h, c = carry
        gates = x_t @ wih + h @ whh + b
        i_g = jax.nn.sigmoid(gates[:, 0 * H:1 * H])
        f_g = jax.nn.sigmoid(gates[:, 1 * H:2 * H])
        g_g = jnp.tanh(gates[:, 2 * H:3 * H])
        o_g = jax.nn.sigmoid(gates[:, 3 * H:4 * H])
        c_new = f_g * c + i_g * g_g
        h_new = o_g * jnp.tanh(c_new)
        return (h_new, c_new), None

    init = (jnp.zeros((B, H), jnp.float32), jnp.zeros((B, H), jnp.float32))
    (h_final, _), _ = jax.lax.scan(step, init, x_tm)
    out = h_final @ wq + bq
    return tuple(out[:, q:q + 1] for q in range(out.shape[1]))


def init_params(key, n_feat, hidden, n_quantiles):
    """Deterministic init, PyTorch-style uniform(-1/sqrt(H), 1/sqrt(H))."""
    k = 1.0 / jnp.sqrt(jnp.float32(hidden))
    keys = jax.random.split(key, 6)
    wih = jax.random.uniform(keys[0], (n_feat, 4 * hidden), jnp.float32, -k, k)
    whh = jax.random.uniform(keys[1], (hidden, 4 * hidden), jnp.float32, -k, k)
    b_ih = jax.random.uniform(keys[2], (1, 4 * hidden), jnp.float32, -k, k)
    b_hh = jax.random.uniform(keys[3], (1, 4 * hidden), jnp.float32, -k, k)
    b = b_ih + b_hh
    wq = jax.random.uniform(keys[4], (hidden, n_quantiles), jnp.float32, -k, k)
    bq = jax.random.uniform(keys[5], (1, n_quantiles), jnp.float32, -k, k)
    return (wih, whh, b, wq, bq)


if __name__ == "__main__":
    # Small shapes consistent with the module: 1 temporal feature, seq=8,
    # batch=2, hidden=32, 3 quantile heads.
    batch, seq, n_feat, hidden, n_quantiles = 2, 8, 1, 32, 3

    key = jax.random.PRNGKey(0)
    k_x, k_p = jax.random.split(key)
    x = jax.random.normal(k_x, (batch, seq, n_feat), jnp.float32)
    params = init_params(k_p, n_feat, hidden, n_quantiles)

    refs = lstm_model_reference(x, params)

    # f32 path, multi-chunk grid (2 chunks of 4 steps): tight check.
    outs = jax.block_until_ready(lstm_model_forward(x, params, seq_chunk=4))
    for o, r in zip(outs, refs):
        assert o.shape == (batch, 1)
        assert jnp.allclose(o, r, atol=1e-5, rtol=1e-5)

    # f32 path, non-dividing chunk (3 chunks, masked padded tail step).
    outs_tail = jax.block_until_ready(lstm_model_forward(x, params, seq_chunk=3))
    for o, r in zip(outs_tail, refs):
        assert o.shape == (batch, 1)
        assert jnp.allclose(o, r, atol=1e-5, rtol=1e-5)

    # bf16 weight/activation path (v6e/v7x MXU fast path): loose check.
    outs_bf16 = jax.block_until_ready(
        lstm_model_forward(x, params, compute_dtype=jnp.bfloat16, seq_chunk=4))
    for o, r in zip(outs_bf16, refs):
        assert o.shape == (batch, 1)
        assert jnp.allclose(o, r, atol=1e-1, rtol=1e-1)

    print("KERNEL_OK")
</pallas_src>

<mosaic_0001>
module attributes {stable_mosaic.version = 11 : i64} {
  func.func @kernel(%arg0: i32, %arg1: memref<32x1xf32, #tpu.memory_space<vmem>>, %arg2: memref<1x128xf32, #tpu.memory_space<vmem>>, %arg3: memref<32x128xf32, #tpu.memory_space<vmem>>, %arg4: memref<1x128xf32, #tpu.memory_space<vmem>>, %arg5: memref<32x128xf32, #tpu.memory_space<vmem>>, %arg6: memref<1x128xf32, #tpu.memory_space<vmem>>, %arg7: memref<8x128xf32, #tpu.memory_space<vmem>>, %arg8: memref<32x128xf32, #tpu.memory_space<vmem>>, %arg9: memref<8x32xf32, #tpu.memory_space<vmem>>, %arg10: memref<8x32xf32, #tpu.memory_space<vmem>>) attributes {dimension_semantics = [#tpu.dimension_semantics<arbitrary>], iteration_bounds = array<i64: 2>, scalar_prefetch = 0 : i64, scratch_operands = 3 : i64, tpu.core_type = #tpu.core_type<tc>, window_params = [{transform_indices = @transform_0, window_bounds = array<i64: 32, 1>}, {pipeline_mode = #tpu.pipeline_mode<synchronous>, transform_indices = @transform_1, window_bounds = array<i64: 1, 128>}, {pipeline_mode = #tpu.pipeline_mode<synchronous>, transform_indices = @transform_2, window_bounds = array<i64: 32, 128>}, {pipeline_mode = #tpu.pipeline_mode<synchronous>, transform_indices = @transform_3, window_bounds = array<i64: 1, 128>}, {pipeline_mode = #tpu.pipeline_mode<synchronous>, transform_indices = @transform_4, window_bounds = array<i64: 32, 128>}, {pipeline_mode = #tpu.pipeline_mode<synchronous>, transform_indices = @transform_5, window_bounds = array<i64: 1, 128>}, {pipeline_mode = #tpu.pipeline_mode<synchronous>, transform_indices = @transform_6, window_bounds = array<i64: 8, 128>}]} {
    %c0_i32 = arith.constant 0 : i32
    %0 = arith.cmpi eq, %arg0, %c0_i32 : i32
    %1 = arith.extui %0 : i1 to i32
    %c0_i32_0 = arith.constant 0 : i32
    %2 = arith.cmpi ne, %1, %c0_i32_0 : i32
    scf.if %2 {
      %cst_57 = arith.constant 0.000000e+00 : f32
      %147 = vector.broadcast %cst_57 : f32 to vector<8x32xf32>
      %c0_58 = arith.constant 0 : index
      %c0_59 = arith.constant 0 : index
      %148 = vector.load %arg9[%c0_58, %c0_59] : memref<8x32xf32, #tpu.memory_space<vmem>>, vector<8x32xf32>
      tpu.vector_store %arg9[%c0_58, %c0_59], %147 {strides = array<i32>} : memref<8x32xf32, #tpu.memory_space<vmem>>, vector<8x32xf32>,
      %cst_60 = arith.constant 0.000000e+00 : f32
      %149 = vector.broadcast %cst_60 : f32 to vector<8x32xf32>
      %c0_61 = arith.constant 0 : index
      %c0_62 = arith.constant 0 : index
      %150 = vector.load %arg10[%c0_61, %c0_62] : memref<8x32xf32, #tpu.memory_space<vmem>>, vector<8x32xf32>
      tpu.vector_store %arg10[%c0_61, %c0_62], %149 {strides = array<i32>} : memref<8x32xf32, #tpu.memory_space<vmem>>, vector<8x32xf32>,
    } else {
    }
    %c0 = arith.constant 0 : index
    %c0_1 = arith.constant 0 : index
    %3 = vector.load %arg4[%c0, %c0_1] : memref<1x128xf32, #tpu.memory_space<vmem>>, vector<1x128xf32>
    %c0_2 = arith.constant 0 : index
    %c0_3 = arith.constant 0 : index
    %4 = vector.load %arg1[%c0_2, %c0_3] : memref<32x1xf32, #tpu.memory_space<vmem>>, vector<32x1xf32>
    %c0_4 = arith.constant 0 : index
    %c0_5 = arith.constant 0 : index
    %5 = vector.load %arg2[%c0_4, %c0_5] : memref<1x128xf32, #tpu.memory_space<vmem>>, vector<1x128xf32>
    %6 = vector.broadcast %4 : vector<32x1xf32> to vector<32x128xf32>
    %7 = vector.broadcast %5 : vector<1x128xf32> to vector<32x128xf32>
    %8 = arith.mulf %6, %7 : vector<32x128xf32>
    %9 = vector.broadcast %3 : vector<1x128xf32> to vector<32x128xf32>
    %10 = arith.addf %9, %8 : vector<32x128xf32>
    %c0_6 = arith.constant 0 : index
    %c0_7 = arith.constant 0 : index
    %11 = vector.load %arg8[%c0_6, %c0_7] : memref<32x128xf32, #tpu.memory_space<vmem>>, vector<32x128xf32>
    tpu.vector_store %arg8[%c0_6, %c0_7], %10 {strides = array<i32>} : memref<32x128xf32, #tpu.memory_space<vmem>>, vector<32x128xf32>,
    %c0_8 = arith.constant 0 : index
    %c0_9 = arith.constant 0 : index
    %12 = vector.load %arg3[%c0_8, %c0_9] : memref<32x128xf32, #tpu.memory_space<vmem>>, vector<32x128xf32>
    %13 = tpu.iota {dimensions = array<i32: 1>} : vector<1x128xi32>
    %c64_i32 = arith.constant 64 : i32
    %14 = vector.broadcast %c64_i32 : i32 to vector<1x128xi32>
    %15 = arith.cmpi sge, %13, %14 : vector<1x128xi32>
    %c96_i32 = arith.constant 96 : i32
    %16 = vector.broadcast %c96_i32 : i32 to vector<1x128xi32>
    %17 = arith.cmpi slt, %13, %16 : vector<1x128xi32>
    %18 = arith.andi %15, %17 : vector<1x128xi1>
    %cst = arith.constant 1.000000e+00 : f32
    %cst_10 = arith.constant 5.000000e-01 : f32
    %19 = vector.broadcast %cst : f32 to vector<1x128xf32>
    %20 = vector.broadcast %cst_10 : f32 to vector<1x128xf32>
    %21 = arith.select %18, %19, %20 : vector<1x128xi1>, vector<1x128xf32>
    %22 = vector.shape_cast %21 : vector<1x128xf32> to vector<1x128xf32>
    %23 = vector.broadcast %22 : vector<1x128xf32> to vector<8x128xf32>
    %c0_11 = arith.constant 0 : index
    %c0_12 = arith.constant 0 : index
    %24 = vector.load %arg9[%c0_11, %c0_12] : memref<8x32xf32, #tpu.memory_space<vmem>>, vector<8x32xf32>
    %c0_13 = arith.constant 0 : index
    %c0_14 = arith.constant 0 : index
    %25 = vector.load %arg10[%c0_13, %c0_14] : memref<8x32xf32, #tpu.memory_space<vmem>>, vector<8x32xf32>
    %c0_i32_15 = arith.constant 0 : i32
    %c8_i32 = arith.constant 8 : i32
    %26 = arith.muli %c0_i32_15, %c8_i32 : i32
    %27 = tpu.assume_multiple %26, 8 : i32
    %28 = arith.index_cast %27 : i32 to index
    %c0_16 = arith.constant 0 : index
    %29 = vector.load %arg8[%28, %c0_16] : memref<32x128xf32, #tpu.memory_space<vmem>>, vector<8x128xf32>
    %cst_17 = arith.constant dense<0.000000e+00> : vector<8x128xf32>
    %30 = tpu.matmul %24, %12, %cst_17 {dimension_numbers = #tpu.dot_dimension_numbers<[1], [0], [0], [1], [0, 0, 1, 1], [], []>} : vector<8x32xf32>, vector<32x128xf32>, vector<8x128xf32> -> vector<8x128xf32>
    %31 = arith.addf %29, %30 : vector<8x128xf32>
    %32 = arith.mulf %31, %23 : vector<8x128xf32>
    %33 = math.tanh %32 : vector<8x128xf32>
    %34 = vector.extract_strided_slice %33 {offsets = [0, 0], sizes = [8, 32], strides = [1, 1]} : vector<8x128xf32> to vector<8x32xf32>
    %cst_18 = arith.constant 5.000000e-01 : f32
    %35 = vector.broadcast %cst_18 : f32 to vector<8x32xf32>
    %36 = arith.mulf %35, %34 : vector<8x32xf32>
    %cst_19 = arith.constant 5.000000e-01 : f32
    %37 = vector.broadcast %cst_19 : f32 to vector<8x32xf32>
    %38 = arith.addf %36, %37 : vector<8x32xf32>
    %39 = vector.extract_strided_slice %33 {offsets = [0, 32], sizes = [8, 32], strides = [1, 1]} : vector<8x128xf32> to vector<8x32xf32>
    %cst_20 = arith.constant 5.000000e-01 : f32
    %40 = vector.broadcast %cst_20 : f32 to vector<8x32xf32>
    %41 = arith.mulf %40, %39 : vector<8x32xf32>
    %cst_21 = arith.constant 5.000000e-01 : f32
    %42 = vector.broadcast %cst_21 : f32 to vector<8x32xf32>
    %43 = arith.addf %41, %42 : vector<8x32xf32>
    %44 = vector.extract_strided_slice %33 {offsets = [0, 64], sizes = [8, 32], strides = [1, 1]} : vector<8x128xf32> to vector<8x32xf32>
    %45 = vector.extract_strided_slice %33 {offsets = [0, 96], sizes = [8, 32], strides = [1, 1]} : vector<8x128xf32> to vector<8x32xf32>
    %cst_22 = arith.constant 5.000000e-01 : f32
    %46 = vector.broadcast %cst_22 : f32 to vector<8x32xf32>
    %47 = arith.mulf %46, %45 : vector<8x32xf32>
    %cst_23 = arith.constant 5.000000e-01 : f32
    %48 = vector.broadcast %cst_23 : f32 to vector<8x32xf32>
    %49 = arith.addf %47, %48 : vector<8x32xf32>
    %50 = arith.mulf %43, %25 : vector<8x32xf32>
    %51 = arith.mulf %38, %44 : vector<8x32xf32>
    %52 = arith.addf %50, %51 : vector<8x32xf32>
    %53 = math.tanh %52 : vector<8x32xf32>
    %54 = arith.mulf %49, %53 : vector<8x32xf32>
    %c1_i32 = arith.constant 1 : i32
    %c8_i32_24 = arith.constant 8 : i32
    %55 = arith.muli %c1_i32, %c8_i32_24 : i32
    %56 = tpu.assume_multiple %55, 8 : i32
    %57 = arith.index_cast %56 : i32 to index
    %c0_25 = arith.constant 0 : index
    %58 = vector.load %arg8[%57, %c0_25] : memref<32x128xf32, #tpu.memory_space<vmem>>, vector<8x128xf32>
    %cst_26 = arith.constant dense<0.000000e+00> : vector<8x128xf32>
    %59 = tpu.matmul %54, %12, %cst_26 {dimension_numbers = #tpu.dot_dimension_numbers<[1], [0], [0], [1], [0, 0, 1, 1], [], []>} : vector<8x32xf32>, vector<32x128xf32>, vector<8x128xf32> -> vector<8x128xf32>
    %60 = arith.addf %58, %59 : vector<8x128xf32>
    %61 = arith.mulf %60, %23 : vector<8x128xf32>
    %62 = math.tanh %61 : vector<8x128xf32>
    %63 = vector.extract_strided_slice %62 {offsets = [0, 0], sizes = [8, 32], strides = [1, 1]} : vector<8x128xf32> to vector<8x32xf32>
    %cst_27 = arith.constant 5.000000e-01 : f32
    %64 = vector.broadcast %cst_27 : f32 to vector<8x32xf32>
    %65 = arith.mulf %64, %63 : vector<8x32xf32>
    %cst_28 = arith.constant 5.000000e-01 : f32
    %66 = vector.broadcast %cst_28 : f32 to vector<8x32xf32>
    %67 = arith.addf %65, %66 : vector<8x32xf32>
    %68 = vector.extract_strided_slice %62 {offsets = [0, 32], sizes = [8, 32], strides = [1, 1]} : vector<8x128xf32> to vector<8x32xf32>
    %cst_29 = arith.constant 5.000000e-01 : f32
    %69 = vector.broadcast %cst_29 : f32 to vector<8x32xf32>
    %70 = arith.mulf %69, %68 : vector<8x32xf32>
    %cst_30 = arith.constant 5.000000e-01 : f32
    %71 = vector.broadcast %cst_30 : f32 to vector<8x32xf32>
    %72 = arith.addf %70, %71 : vector<8x32xf32>
    %73 = vector.extract_strided_slice %62 {offsets = [0, 64], sizes = [8, 32], strides = [1, 1]} : vector<8x128xf32> to vector<8x32xf32>
    %74 = vector.extract_strided_slice %62 {offsets = [0, 96], sizes = [8, 32], strides = [1, 1]} : vector<8x128xf32> to vector<8x32xf32>
    %cst_31 = arith.constant 5.000000e-01 : f32
    %75 = vector.broadcast %cst_31 : f32 to vector<8x32xf32>
    %76 = arith.mulf %75, %74 : vector<8x32xf32>
    %cst_32 = arith.constant 5.000000e-01 : f32
    %77 = vector.broadcast %cst_32 : f32 to vector<8x32xf32>
    %78 = arith.addf %76, %77 : vector<8x32xf32>
    %79 = arith.mulf %72, %52 : vector<8x32xf32>
    %80 = arith.mulf %67, %73 : vector<8x32xf32>
    %81 = arith.addf %79, %80 : vector<8x32xf32>
    %82 = math.tanh %81 : vector<8x32xf32>
    %83 = arith.mulf %78, %82 : vector<8x32xf32>
    %c2_i32 = arith.constant 2 : i32
    %c8_i32_33 = arith.constant 8 : i32
    %84 = arith.muli %c2_i32, %c8_i32_33 : i32
    %85 = tpu.assume_multiple %84, 8 : i32
    %86 = arith.index_cast %85 : i32 to index
    %c0_34 = arith.constant 0 : index
    %87 = vector.load %arg8[%86, %c0_34] : memref<32x128xf32, #tpu.memory_space<vmem>>, vector<8x128xf32>
    %cst_35 = arith.constant dense<0.000000e+00> : vector<8x128xf32>
    %88 = tpu.matmul %83, %12, %cst_35 {dimension_numbers = #tpu.dot_dimension_numbers<[1], [0], [0], [1], [0, 0, 1, 1], [], []>} : vector<8x32xf32>, vector<32x128xf32>, vector<8x128xf32> -> vector<8x128xf32>
    %89 = arith.addf %87, %88 : vector<8x128xf32>
    %90 = arith.mulf %89, %23 : vector<8x128xf32>
    %91 = math.tanh %90 : vector<8x128xf32>
    %92 = vector.extract_strided_slice %91 {offsets = [0, 0], sizes = [8, 32], strides = [1, 1]} : vector<8x128xf32> to vector<8x32xf32>
    %cst_36 = arith.constant 5.000000e-01 : f32
    %93 = vector.broadcast %cst_36 : f32 to vector<8x32xf32>
    %94 = arith.mulf %93, %92 : vector<8x32xf32>
    %cst_37 = arith.constant 5.000000e-01 : f32
    %95 = vector.broadcast %cst_37 : f32 to vector<8x32xf32>
    %96 = arith.addf %94, %95 : vector<8x32xf32>
    %97 = vector.extract_strided_slice %91 {offsets = [0, 32], sizes = [8, 32], strides = [1, 1]} : vector<8x128xf32> to vector<8x32xf32>
    %cst_38 = arith.constant 5.000000e-01 : f32
    %98 = vector.broadcast %cst_38 : f32 to vector<8x32xf32>
    %99 = arith.mulf %98, %97 : vector<8x32xf32>
    %cst_39 = arith.constant 5.000000e-01 : f32
    %100 = vector.broadcast %cst_39 : f32 to vector<8x32xf32>
    %101 = arith.addf %99, %100 : vector<8x32xf32>
    %102 = vector.extract_strided_slice %91 {offsets = [0, 64], sizes = [8, 32], strides = [1, 1]} : vector<8x128xf32> to vector<8x32xf32>
    %103 = vector.extract_strided_slice %91 {offsets = [0, 96], sizes = [8, 32], strides = [1, 1]} : vector<8x128xf32> to vector<8x32xf32>
    %cst_40 = arith.constant 5.000000e-01 : f32
    %104 = vector.broadcast %cst_40 : f32 to vector<8x32xf32>
    %105 = arith.mulf %104, %103 : vector<8x32xf32>
    %cst_41 = arith.constant 5.000000e-01 : f32
    %106 = vector.broadcast %cst_41 : f32 to vector<8x32xf32>
    %107 = arith.addf %105, %106 : vector<8x32xf32>
    %108 = arith.mulf %101, %81 : vector<8x32xf32>
    %109 = arith.mulf %96, %102 : vector<8x32xf32>
    %110 = arith.addf %108, %109 : vector<8x32xf32>
    %111 = math.tanh %110 : vector<8x32xf32>
    %112 = arith.mulf %107, %111 : vector<8x32xf32>
    %c3_i32 = arith.constant 3 : i32
    %c8_i32_42 = arith.constant 8 : i32
    %113 = arith.muli %c3_i32, %c8_i32_42 : i32
    %114 = tpu.assume_multiple %113, 8 : i32
    %115 = arith.index_cast %114 : i32 to index
    %c0_43 = arith.constant 0 : index
    %116 = vector.load %arg8[%115, %c0_43] : memref<32x128xf32, #tpu.memory_space<vmem>>, vector<8x128xf32>
    %cst_44 = arith.constant dense<0.000000e+00> : vector<8x128xf32>
    %117 = tpu.matmul %112, %12, %cst_44 {dimension_numbers = #tpu.dot_dimension_numbers<[1], [0], [0], [1], [0, 0, 1, 1], [], []>} : vector<8x32xf32>, vector<32x128xf32>, vector<8x128xf32> -> vector<8x128xf32>
    %118 = arith.addf %116, %117 : vector<8x128xf32>
    %119 = arith.mulf %118, %23 : vector<8x128xf32>
    %120 = math.tanh %119 : vector<8x128xf32>
    %121 = vector.extract_strided_slice %120 {offsets = [0, 0], sizes = [8, 32], strides = [1, 1]} : vector<8x128xf32> to vector<8x32xf32>
    %cst_45 = arith.constant 5.000000e-01 : f32
    %122 = vector.broadcast %cst_45 : f32 to vector<8x32xf32>
    %123 = arith.mulf %122, %121 : vector<8x32xf32>
    %cst_46 = arith.constant 5.000000e-01 : f32
    %124 = vector.broadcast %cst_46 : f32 to vector<8x32xf32>
    %125 = arith.addf %123, %124 : vector<8x32xf32>
    %126 = vector.extract_strided_slice %120 {offsets = [0, 32], sizes = [8, 32], strides = [1, 1]} : vector<8x128xf32> to vector<8x32xf32>
    %cst_47 = arith.constant 5.000000e-01 : f32
    %127 = vector.broadcast %cst_47 : f32 to vector<8x32xf32>
    %128 = arith.mulf %127, %126 : vector<8x32xf32>
    %cst_48 = arith.constant 5.000000e-01 : f32
    %129 = vector.broadcast %cst_48 : f32 to vector<8x32xf32>
    %130 = arith.addf %128, %129 : vector<8x32xf32>
    %131 = vector.extract_strided_slice %120 {offsets = [0, 64], sizes = [8, 32], strides = [1, 1]} : vector<8x128xf32> to vector<8x32xf32>
    %132 = vector.extract_strided_slice %120 {offsets = [0, 96], sizes = [8, 32], strides = [1, 1]} : vector<8x128xf32> to vector<8x32xf32>
    %cst_49 = arith.constant 5.000000e-01 : f32
    %133 = vector.broadcast %cst_49 : f32 to vector<8x32xf32>
    %134 = arith.mulf %133, %132 : vector<8x32xf32>
    %cst_50 = arith.constant 5.000000e-01 : f32
    %135 = vector.broadcast %cst_50 : f32 to vector<8x32xf32>
    %136 = arith.addf %134, %135 : vector<8x32xf32>
    %137 = arith.mulf %130, %110 : vector<8x32xf32>
    %138 = arith.mulf %125, %131 : vector<8x32xf32>
    %139 = arith.addf %137, %138 : vector<8x32xf32>
    %140 = math.tanh %139 : vector<8x32xf32>
    %141 = arith.mulf %136, %140 : vector<8x32xf32>
    %c4_i32 = arith.constant 4 : i32
    %c0_51 = arith.constant 0 : index
    %c0_52 = arith.constant 0 : index
    %142 = vector.load %arg9[%c0_51, %c0_52] : memref<8x32xf32, #tpu.memory_space<vmem>>, vector<8x32xf32>
    tpu.vector_store %arg9[%c0_51, %c0_52], %141 {strides = array<i32>} : memref<8x32xf32, #tpu.memory_space<vmem>>, vector<8x32xf32>,
    %c0_53 = arith.constant 0 : index
    %c0_54 = arith.constant 0 : index
    %143 = vector.load %arg10[%c0_53, %c0_54] : memref<8x32xf32, #tpu.memory_space<vmem>>, vector<8x32xf32>
    tpu.vector_store %arg10[%c0_53, %c0_54], %139 {strides = array<i32>} : memref<8x32xf32, #tpu.memory_space<vmem>>, vector<8x32xf32>,
    %c1_i32_55 = arith.constant 1 : i32
    %144 = arith.cmpi eq, %arg0, %c1_i32_55 : i32
    %145 = arith.extui %144 : i1 to i32
    %c0_i32_56 = arith.constant 0 : i32
    %146 = arith.cmpi ne, %145, %c0_i32_56 : i32
    scf.if %146 {
      %c0_57 = arith.constant 0 : index
      %c0_58 = arith.constant 0 : index
      %147 = vector.load %arg5[%c0_57, %c0_58] : memref<32x128xf32, #tpu.memory_space<vmem>>, vector<32x128xf32>
      %cst_59 = arith.constant dense<0.000000e+00> : vector<8x128xf32>
      %148 = tpu.matmul %141, %147, %cst_59 {dimension_numbers = #tpu.dot_dimension_numbers<[1], [0], [0], [1], [0, 0, 1, 1], [], []>} : vector<8x32xf32>, vector<32x128xf32>, vector<8x128xf32> -> vector<8x128xf32>
      %c0_60 = arith.constant 0 : index
      %c0_61 = arith.constant 0 : index
      %149 = vector.load %arg6[%c0_60, %c0_61] : memref<1x128xf32, #tpu.memory_space<vmem>>, vector<1x128xf32>
      %150 = vector.broadcast %149 : vector<1x128xf32> to vector<8x128xf32>
      %151 = arith.addf %148, %150 : vector<8x128xf32>
      %c0_62 = arith.constant 0 : index
      %c0_63 = arith.constant 0 : index
      %152 = vector.load %arg7[%c0_62, %c0_63] : memref<8x128xf32, #tpu.memory_space<vmem>>, vector<8x128xf32>
      tpu.vector_store %arg7[%c0_62, %c0_63], %151 {strides = array<i32>} : memref<8x128xf32, #tpu.memory_space<vmem>>, vector<8x128xf32>,
    } else {
    }
    return
  }
  func.func @transform_0(%arg0: i32) -> (i32, i32) {
    %c0_i32 = arith.constant 0 : i32
    %c0_i32_0 = arith.constant 0 : i32
    return %arg0, %c0_i32 : i32, i32
  }
  func.func @transform_1(%arg0: i32) -> (i32, i32) {
    %c0_i32 = arith.constant 0 : i32
    %c0_i32_0 = arith.constant 0 : i32
    %c0_i32_1 = arith.constant 0 : i32
    return %c0_i32, %c0_i32_0 : i32, i32
  }
  func.func @transform_2(%arg0: i32) -> (i32, i32) {
    %c0_i32 = arith.constant 0 : i32
    %c0_i32_0 = arith.constant 0 : i32
    %c0_i32_1 = arith.constant 0 : i32
    return %c0_i32, %c0_i32_0 : i32, i32
  }
  func.func @transform_3(%arg0: i32) -> (i32, i32) {
    %c0_i32 = arith.constant 0 : i32
    %c0_i32_0 = arith.constant 0 : i32
    %c0_i32_1 = arith.constant 0 : i32
    return %c0_i32, %c0_i32_0 : i32, i32
  }
  func.func @transform_4(%arg0: i32) -> (i32, i32) {
    %c0_i32 = arith.constant 0 : i32
    %c0_i32_0 = arith.constant 0 : i32
    %c0_i32_1 = arith.constant 0 : i32
    return %c0_i32, %c0_i32_0 : i32, i32
  }
  func.func @transform_5(%arg0: i32) -> (i32, i32) {
    %c0_i32 = arith.constant 0 : i32
    %c0_i32_0 = arith.constant 0 : i32
    %c0_i32_1 = arith.constant 0 : i32
    return %c0_i32, %c0_i32_0 : i32, i32
  }
  func.func @transform_6(%arg0: i32) -> (i32, i32) {
    %c0_i32 = arith.constant 0 : i32
    %c0_i32_0 = arith.constant 0 : i32
    %c0_i32_1 = arith.constant 0 : i32
    return %c0_i32, %c0_i32_0 : i32, i32
  }
}

</mosaic_0001>

<bundles_post_ra>
// kernel: tpu_custom_call.1
= control target key start
LH: loop header
LB: loop body
LE: loop exit
PB: predicated region body
PF: predicated region fallthrough
CT: control target
= control target key end

     0   :  { %11 = vsyncpa [#allocation6], 0  ;;  %s736_s21 = smov 0   ;;  %s840_s0 = inlined_call_operand.vmem [shape: f32[64,1], index: 0, kind: input, shape index: {}]   ;;  %s841_s1 = inlined_call_operand.vmem [shape: f32[1,128], index: 1, kind: input, shape index: {}]   ;;  %s842_s2 = inlined_call_operand.vmem [shape: f32[32,128], index: 2, kind: input, shape index: {}]   ;;  %s843_s3 = inlined_call_operand.vmem [shape: f32[1,128], index: 3, kind: input, shape index: {}]   ;;  %s844_s4 = inlined_call_operand.vmem [shape: f32[32,128], index: 4, kind: input, shape index: {}]   ;;  %s845_s5 = inlined_call_operand.vmem [shape: f32[1,128], index: 5, kind: input, shape index: {}]   ;;  %s846_s6 = inlined_call_operand.hbm [shape: f32[8,128], index: 6, kind: output, shape index: {}]  }
   0x1 LB: > { %s742_s22 = sadd.s32 4294967295, %s692_s21   ;;  %p597_p0 = scmp.ge.s32.totalorder %s692_s21, 1  ;;  %s692_s21 = sphi %s736_s21, %s17_s21  }
   0x2   : > { %p209_p1 = scmp.lt.s32.totalorder %s692_s21, 3 }
   0x4   : > { %p210_p2 = pnand %p597_p0, %p209_p1 }
   0x5   : > { %s598_s23 = sshll.u32 (!%p210_p2), %s742_s22, 2  ;;  %p600_p4 = scmp.ne.s32.totalorder (!%p210_p2), %s742_s22, 0 }
   0x6   : > { %213 = sbr.rel (%p210_p2) target bundleno = 2478 (0x9ae), region = 44  ;;  %p235_p3 = scmp.lt.s32.totalorder (!%p210_p2), %s598_s23, 7 }
   0xb   : > { %s848_s23 = smov (!%p235_p3, %s598_s23), 7  ;;  %243 = sbr.rel (%p600_p4) target bundleno = 19 (0x13), region = 48 }
   0xc   : > { %s599_s24 = sshll.u32 %s848_s23, 3 }
   0xd   : > { %s750_s27 = scalar_lea.vmem %s840_s0, %s599_s24 }
  0x10   : > { %vm244_vm0 = vcmask 261120   ;;  %v694_v0 = vmov 0.0  }
  0x11   : > { %245 = vst.msk [vmem:[#allocation3] sm:$0xff] %vm244_vm0, %v694_v0 }
  0x12   : > { %246 = vst.msk [vmem:[#allocation4] sm:$0xff] %vm244_vm0, %v694_v0 }
  0x13 PF: > { %v294_v1 = vld [vmem:[%s842_s2 + $0x18] sm:$0xff]  ;;  %v293_v2 = vld [vmem:[%s842_s2 + $0x10] sm:$0xff]  ;;  %v695_v3 = vmov 0   ;;  %v248_v4 = vld [vmem:[%s750_s27] sm:$0xff]  ;;  %s696_s10 = smov 32   ;;  %vm304_vm1 = vcmask 261120   ;;  %v295_v9 = vlaneseq }
  0x14   : > { %320 = vmatpush.msra.mxu0 %v294_v1  ;;  %632 = vset.pattern.permute.xlu0 %v695_v3  ;;  %v292_v5 = vld [vmem:[%s842_s2 + $0x8] sm:$0xff]  ;;  %v291_v7 = vld [vmem:[%s842_s2] sm:$0xff]  ;;  %v697_v16 = vmov 0.5   ;;  %s698_s17 = smov 64   ;;  %v250_v52 = vld [vmem:[%s750_s27 + $0x10] sm:$0xff]  ;;  %s699_s18 = smov 96  }
  0x15   : > { %255 = vperm.xlu0 %632, %v248_v4   ;;  %373 = vmatpush.msra.mxu1 %v294_v1  ;;  %v771_v10 = vld [vmem:[%s841_s1] ss:$0 sm:$0xff]  ;;  %v296_v12 = vand.u32 127, %v295_v9  ;;  %v249_v22 = vld [vmem:[%s750_s27 + $0x8] sm:$0xff]  ;;  %p605_p5 = scmp.ne.s32.totalorder %s742_s22, 1 }
  0x16   : > { %321 = vmatpush.msra.mxu0 %v293_v2  ;;  %422 = vmatpush.msra.mxu2 %v294_v1  ;;  %v777_v14 = vld [vmem:[%s843_s3] ss:$0 sm:$0xff] }
  0x17   : > { %374 = vmatpush.msra.mxu1 %v293_v2  ;;  %633 = vset.pattern.permute.xlu2 %v695_v3  ;;  %vm297_vm2 = vcmp.ge.s32.totalorder %v296_v12, 64  ;;  %vm298_vm3 = vcmp.lt.s32.totalorder %v296_v12, 96 }
  0x18   : > { %322 = vmatpush.msra.mxu0 %v292_v5  ;;  %v301_v8 = vld [vmem:[#allocation3] sm:$0xff]  ;;  %423 = vmatpush.msra.mxu2 %v293_v2  ;;  %vm299_vm4 = vmand %vm297_vm2, %vm298_vm3 }
  0x19   : > { %v302_v6 = vld [vmem:[#allocation4] sm:$0xff]  ;;  %375 = vmatpush.msra.mxu1 %v292_v5  ;;  %471 = vmatpush.msra.mxu3 %v294_v1  ;;  %v780_v17 = vsel %vm299_vm4, 1.0, %v697_v16 }
  0x1a   : > { %334 = vrot.lane.b32.xlu1 %v302_v6, %s696_s10  ;;  %323 = vmatpush.msra.mxu0 %v291_v7 }
  0x1b   : > { %601 = vmatmul.msk.f32.vlgmr.msra.gmra.mxu0 %vm304_vm1, %v301_v8  ;;  %376 = vmatpush.msra.mxu1 %v291_v7 }
  0x1c   : > { %424 = vmatpush.msra.mxu2 %v292_v5  ;;  %472 = vmatpush.msra.mxu3 %v293_v2 }
  0x1d   : > { %634 = vset.pattern.permute.xlu1 %v695_v3 }
  0x1e   : > { %425 = vmatpush.msra.mxu2 %v291_v7  ;;  %473 = vmatpush.msra.mxu3 %v292_v5 }
  0x20   : > { %474 = vmatpush.msra.mxu3 %v291_v7  ;;  %v251_v7 = vld [vmem:[%s750_s27 + $0x18] sm:$0xff] }
  0x87   : > { %v256_v11 = vpop.permute.xlu0 %255 }
  0x88   : > { %v276_v13 = vmul.f32 %v771_v10, %v256_v11 }
  0x8a   : > { %v283_v15 = vadd.f32 %v777_v14, %v276_v13 }
  0x8c   : > { %v335_v27 = vpop.permute.xlu1 %334 }
  0x98   : > { %v325_v18 = vpop.f32.mrf.mxu0 }
  0x99   : > { %v328_v19 = vadd.f32 %v325_v18, %v283_v15 }
  0x9b   : > { %v329_v20 = vmul.f32 %v328_v19, %v780_v17 }
  0x9d   : > { %637 = vtanh.f32 %v329_v20 }
  0xa3   : > { %v638_v21 = vpop.eup %637 }
  0xa4   : > { %339 = vrot.lane.b32.xlu0 %v638_v21, %s698_s17  ;;  %v331_v23 = vmul.f32 0.5, %v638_v21 }
  0xa6   : > { %v332_v24 = vadd.f32 0.5, %v331_v23 }
  0xa8   : > { %v337_v28 = vmul.f32 %v335_v27, %v332_v24 }
  0xac   : > { %260 = vperm.xlu0 %632, %v249_v22  }
 0x116   : > { %v340_v25 = vpop.permute.xlu0 %339 }
 0x117   : > { %v342_v26 = vmul.f32 %v340_v25, %v332_v24 }
 0x119   : > { %344 = vrot.lane.b32.xlu1 %v342_v26, %s696_s10 }
 0x11e   : > { %v261_v35 = vpop.permute.xlu0 %260 }
 0x11f   : > { %v277_v36 = vmul.f32 %v771_v10, %v261_v35 }
 0x121   : > { %v284_v37 = vadd.f32 %v777_v14, %v277_v36 }
 0x18b   : > { %v345_v29 = vpop.permute.xlu1 %344 }
 0x18c   : > { %v347_v30 = vadd.f32 %v345_v29, %v337_v28 }
 0x18e   : > { %639 = vtanh.f32 %v347_v30 }
 0x194   : > { %v640_v31 = vpop.eup %639 }
 0x195   : > { %350 = vrot.lane.b32.xlu2 %v640_v31, %s698_s17 }
 0x1ef   : > { %v351_v32 = vpop.permute.xlu2 %350 }
 0x1f0   : > { %v353_v33 = vmul.f32 %v351_v32, %v332_v24 }
 0x1f2   : > { %357 = vrot.lane.b32.xlu2 %v353_v33, %s696_s10 }
 0x24c   : > { %v358_v34 = vpop.permute.xlu2 %357 }
 0x24d   : > { %602 = vmatmul.msk.f32.vlgmr.msra.gmra.mxu1 %vm304_vm1, %v358_v34 }
 0x2ca   : > { %v378_v38 = vpop.f32.mrf.mxu1 }
 0x2cb   : > { %v381_v39 = vadd.f32 %v378_v38, %v284_v37 }
 0x2cd   : > { %v382_v40 = vmul.f32 %v381_v39, %v780_v17 }
 0x2cf   : > { %641 = vtanh.f32 %v382_v40 }
 0x2d5   : > { %v642_v41 = vpop.eup %641 }
 0x2d6   : > { %388 = vrot.lane.b32.xlu1 %v642_v41, %s698_s17  ;;  %v384_v42 = vmul.f32 0.5, %v642_v41 }
 0x2d8   : > { %v385_v43 = vadd.f32 0.5, %v384_v42 }
 0x2da   : > { %v386_v46 = vmul.f32 %v385_v43, %v347_v30 }
 0x348   : > { %v389_v44 = vpop.permute.xlu1 %388 }
 0x349   : > { %v391_v45 = vmul.f32 %v389_v44, %v385_v43 }
 0x34b   : > { %393 = vrot.lane.b32.xlu2 %v391_v45, %s696_s10 }
 0x353   : > { %265 = vperm.xlu2 %633, %v250_v52  }
 0x3a5   : > { %v394_v47 = vpop.permute.xlu2 %393 }
 0x3a6   : > { %v396_v48 = vadd.f32 %v394_v47, %v386_v46 }
 0x3a8   : > { %643 = vtanh.f32 %v396_v48 }
 0x3ad   : > { %v266_v54 = vpop.permute.xlu2 %265 }
 0x3ae   : > { %v644_v49 = vpop.eup %643  ;;  %v278_v55 = vmul.f32 %v771_v10, %v266_v54 }
 0x3af   : > { %399 = vrot.lane.b32.xlu0 %v644_v49, %s698_s17 }
 0x3b0   : > { %v285_v56 = vadd.f32 %v777_v14, %v278_v55 }
 0x421   : > { %v400_v50 = vpop.permute.xlu0 %399 }
 0x422   : > { %v402_v51 = vmul.f32 %v400_v50, %v385_v43 }
 0x424   : > { %406 = vrot.lane.b32.xlu1 %v402_v51, %s696_s10 }
 0x496   : > { %v407_v53 = vpop.permute.xlu1 %406 }
 0x497   : > { %603 = vmatmul.msk.f32.vlgmr.msra.gmra.mxu2 %vm304_vm1, %v407_v53 }
 0x51a   : > { %v427_v57 = vpop.f32.mrf.mxu2 }
 0x51b   : > { %v430_v58 = vadd.f32 %v427_v57, %v285_v56 }
 0x51d   : > { %v431_v59 = vmul.f32 %v430_v58, %v780_v17 }
 0x51f   : > { %645 = vtanh.f32 %v431_v59 }
 0x525   : > { %v646_v60 = vpop.eup %645 }
 0x526   : > { %437 = vrot.lane.b32.xlu0 %v646_v60, %s698_s17  ;;  %v433_v61 = vmul.f32 0.5, %v646_v60 }
 0x528   : > { %v434_v62 = vadd.f32 0.5, %v433_v61 }
 0x52a   : > { %v435_v1 = vmul.f32 %v434_v62, %v396_v48 }
 0x598   : > { %v438_v63 = vpop.permute.xlu0 %437 }
 0x599   : > { %v440_v0 = vmul.f32 %v438_v63, %v434_v62 }
 0x59b   : > { %442 = vrot.lane.b32.xlu1 %v440_v0, %s696_s10 }
 0x5a3   : > { %270 = vperm.xlu1 %634, %v251_v7  }
 0x60d   : > { %v443_v2 = vpop.permute.xlu1 %442 }
 0x60e   : > { %v445_v3 = vadd.f32 %v443_v2, %v435_v1 }
 0x610   : > { %647 = vtanh.f32 %v445_v3 }
 0x615   : > { %v271_v9 = vpop.permute.xlu1 %270 }
 0x616   : > { %v648_v4 = vpop.eup %647  ;;  %v279_v11 = vmul.f32 %v771_v10, %v271_v9 }
 0x617   : > { %448 = vrot.lane.b32.xlu2 %v648_v4, %s698_s17 }
 0x618   : > { %v286_v12 = vadd.f32 %v777_v14, %v279_v11 }
 0x671   : > { %v449_v5 = vpop.permute.xlu2 %448 }
 0x672   : > { %v451_v6 = vmul.f32 %v449_v5, %v434_v62 }
 0x674   : > { %455 = vrot.lane.b32.xlu0 %v451_v6, %s696_s10 }
 0x6e6   : > { %v456_v8 = vpop.permute.xlu0 %455 }
 0x6e7   : > { %604 = vmatmul.msk.f32.vlgmr.msra.gmra.mxu3 %vm304_vm1, %v456_v8 }
 0x76a   : > { %v476_v13 = vpop.f32.mrf.mxu3 }
 0x76b   : > { %v479_v15 = vadd.f32 %v476_v13, %v286_v12 }
 0x76d   : > { %v480_v16 = vmul.f32 %v479_v15, %v780_v17 }
 0x76f   : > { %649 = vtanh.f32 %v480_v16 }
 0x775   : > { %v650_v18 = vpop.eup %649 }
 0x776   : > { %486 = vrot.lane.b32.xlu2 %v650_v18, %s698_s17  ;;  %v482_v19 = vmul.f32 0.5, %v650_v18 }
 0x778   : > { %v483_v20 = vadd.f32 0.5, %v482_v19 }
 0x77a   : > { %v484_v23 = vmul.f32 %v483_v20, %v445_v3 }
 0x7d0   : > { %v487_v21 = vpop.permute.xlu2 %486 }
 0x7d1   : > { %v489_v22 = vmul.f32 %v487_v21, %v483_v20 }
 0x7d3   : > { %491 = vrot.lane.b32.xlu0 %v489_v22, %s696_s10 }
 0x845   : > { %v492_v24 = vpop.permute.xlu0 %491 }
 0x846   : > { %v494_v25 = vadd.f32 %v492_v24, %v484_v23 }
 0x848   : > { %651 = vtanh.f32 %v494_v25  ;;  %507 = vrot.lane.b32.xlu0 %v494_v25, %s699_s18 }
 0x84e   : > { %v652_v10 = vpop.eup %651 }
 0x84f   : > { %497 = vrot.lane.b32.xlu1 %v652_v10, %s698_s17 }
 0x8ba   : > { %v508_v14 = vpop.permute.xlu0 %507 }
 0x8bb   : > { %510 = vst.msk [vmem:[#allocation4] sm:$0xff] %vm304_vm1, %v508_v14 }
 0x8c1   : > { %v498_v17 = vpop.permute.xlu1 %497 }
 0x8c2   : > { %v500_v26 = vmul.f32 %v498_v17, %v483_v20 }
 0x8c4   : > { %502 = vrot.lane.b32.xlu2 %v500_v26, %s696_s10 }
 0x91b   : > { %514 = sbr.rel (%p605_p5) target bundleno = 2473 (0x9a9), region = 52 }
 0x91e   : > { %v503_v27 = vpop.permute.xlu2 %502 }
 0x91f   : > { %505 = vst.msk [vmem:[#allocation3] sm:$0xff] %vm304_vm1, %v503_v27 }
 0x920   : > { %v518_v28 = vld [vmem:[%s844_s4 + $0x18] sm:$0xff]  ;;  %v517_v29 = vld [vmem:[%s844_s4 + $0x10] sm:$0xff]  ;;  %v516_v30 = vld [vmem:[%s844_s4 + $0x8] sm:$0xff] }
 0x921   : > { %537 = vmatpush.msra.mxu0 %v518_v28  ;;  %v515_v31 = vld [vmem:[%s844_s4] sm:$0xff] }
 0x922   : > { %v653_v32 = vld [vmem:[%s845_s5] ss:$0 sm:$0xff] }
 0x923   : > { %538 = vmatpush.msra.mxu0 %v517_v29 }
 0x925   : > { %539 = vmatpush.msra.mxu0 %v516_v30 }
 0x927   : > { %540 = vmatpush.msra.mxu0 %v515_v31 }
 0x928   : > { %606 = vmatmul.msk.f32.vlgmr.msra.gmra.mxu0 %vm304_vm1, %v503_v27 }
 0x9a5   : > { %v542_v33 = vpop.f32.mrf.mxu0 }
 0x9a6   : > { %v543_v34 = vadd.f32 %v653_v32, %v542_v33 }
 0x9a8   : > { %545 = vst [vmem:[#allocation5] sm:$0xff] %v543_v34 }
 0x9a9 PF: > { %p615_p6 = scmp.eq.s32.totalorder %s742_s22, 1  ;;  %s700_s7 = smov [#allocation5]  }
 0x9aa   : > { %s552_s8 = sshll.u32 %s700_s7, 4  ;;  %s554_s11 = sshll.u32 %s846_s6, 4  ;;  %s553_s8 = int_to_ptr.vmem [resolvable:$true] %s552_s8  ;;  %s555_s11 = int_to_ptr.hbm [resolvable:$true] %s554_s11 }
 0x9ab   : > { %612 = dma.vmem_to_hbm [thread:$0]  (%p615_p6), %s553_s8, 128, %s555_s11, [#allocation6]  }
 0x9ac   : > { %687 = dma.done.wait (%p615_p6), [#allocation6], 128  }
 0x9ad   : > { %689 = vsyncadd (%p615_p6), [#allocation6], 4294967168 }
 0x9ae PF: > { %s17_s21 = sadd.s32 1, %s692_s21  }
 0x9af   : > { %p14_p7 = scmp.ge.s32.totalorder %s17_s21, 4  }
 0x9b1   :  { %16 = sbr.rel (!%p14_p7) target bundleno = 1 (0x1), region = 82 }
 0x9b6   :  { %568 = vsyncpa [#allocation6], 1 }
 0x9b7   :  { %570 = vsyncpa [#allocation6 + $0x1], 1 }

</bundles_post_ra>
